<compile_context>
chip_gen: v5e
topology: v5e:2x2
jax: 0.10.0
libtpu: 0.0.40
codegen_flags: <defaults>
</compile_context>

<pallas_src>
import functools
import jax
import jax.numpy as jnp
from jax import lax
from jax.experimental import pallas as pl
from jax.experimental.pallas import tpu as pltpu


def _attention_kernel(x_ref, wq_ref, wk_ref, wvo_ref, bout_ref, o_ref,
                      *, block_b, seq_len, heads, dim_head, out_dim_p):
    """One grid step processes `block_b` full sequences (rows = block_b*N).

    x_ref    : (rows, D)              bf16, streamed
    wq_ref   : (D, inner)             bf16, resident (softmax scale folded in)
    wk_ref   : (D, inner)             bf16, resident
    wvo_ref  : (heads, D, out_dim_p)  bf16, resident (per-head W_v @ W_out, padded)
    bout_ref : (1, out_dim_p)         f32,  resident (zero-padded)
    o_ref    : (rows, out_dim_p)      lane-dense output tile
    """
    rows = block_b * seq_len
    x_bf = x_ref[...]                                               # (rows, D) bf16

    # Q/K projections over the whole row tile; f32 accumulation, one
    # full-width down-cast each (hoisted out of the head loop).
    q = jnp.dot(x_bf, wq_ref[...], preferred_element_type=jnp.float32).astype(jnp.bfloat16)
    k = jnp.dot(x_bf, wk_ref[...], preferred_element_type=jnp.float32).astype(jnp.bfloat16)

    # TODO(synk): replace the static head loop with a single batched-head
    # dot_general once a (b, n, h, d) -> (b, h, n, d) relayout is cheap/robust
    # in Mosaic; the remaining per-head cost is only the 8-lane Q/K slices.
    proj = None
    for h in range(heads):
        sl = slice(h * dim_head, (h + 1) * dim_head)
        qh = q[:, sl].reshape(block_b, seq_len, dim_head)
        kh = k[:, sl].reshape(block_b, seq_len, dim_head)

        # scores (block_b, N, N) in f32 (scale already folded into W_q)
        dots = lax.dot_general(
            qh, kh,
            dimension_numbers=(((2,), (2,)), ((0,), (0,))),
            preferred_element_type=jnp.float32)

        # exact softmax over the last (tiny) axis, f32 math
        m = jnp.max(dots, axis=-1, keepdims=True)
        e = jnp.exp(dots - m)
        attn = (e / jnp.sum(e, axis=-1, keepdims=True)).astype(jnp.bfloat16)

        # V projection fused with the output projection: lane-dense (rows, 128)
        # tiles, no 8-lane value strips and no head concat.
        vo = jnp.dot(x_bf, wvo_ref[h], preferred_element_type=jnp.float32)
        vo = vo.astype(jnp.bfloat16).reshape(block_b, seq_len, out_dim_p)

        ph = lax.dot_general(
            attn, vo,
            dimension_numbers=(((2,), (1,)), ((0,), (0,))),
            preferred_element_type=jnp.float32)                     # (b, N, out_p)
        ph = ph.reshape(rows, out_dim_p)
        proj = ph if proj is None else proj + ph

    o_ref[...] = (proj + bout_ref[...]).astype(o_ref.dtype)


def attention_forward(x, w_qkv, w_out, b_out, *, heads, dim_head, target_rows=1024):
    """x: (B, N, D) -> (B, N, out_dim) where out_dim = w_out.shape[1]."""
    B, N, D = x.shape
    inner = heads * dim_head
    out_dim = w_out.shape[1]
    scale = dim_head ** (-0.5)

    # ---------------- one-time weight prep (outside the kernel) -------------
    w_q = w_qkv[:, 0 * inner:1 * inner] * scale      # fold softmax scale into W_q
    w_k = w_qkv[:, 1 * inner:2 * inner]
    w_v = w_qkv[:, 2 * inner:3 * inner]

    # Lane-dense output: pad projection width to a multiple of 128.
    out_dim_p = ((out_dim + 127) // 128) * 128
    w_out_p = jnp.zeros((inner, out_dim_p), w_out.dtype).at[:, :out_dim].set(w_out)
    b_out_p = jnp.zeros((1, out_dim_p), jnp.float32).at[:, :out_dim].set(
        b_out.reshape(1, out_dim).astype(jnp.float32))

    # Fold each head's V projection into the padded output projection:
    #   W_vo[h] = W_v[:, h*dh:(h+1)*dh] @ W_out[h*dh:(h+1)*dh, :]
    w_vo = jnp.einsum('dhe,heo->hdo',
                      w_v.reshape(D, heads, dim_head),
                      w_out_p.reshape(heads, dim_head, out_dim_p))  # (H, D, out_p)

    # Resident MXU weights live in bf16 (cast once here, not per grid step).
    w_q_bf = w_q.astype(jnp.bfloat16)
    w_k_bf = w_k.astype(jnp.bfloat16)
    w_vo_bf = w_vo.astype(jnp.bfloat16)

    # Stream x in bf16 (kernel feeds the MXU bf16 anyway -> identical math,
    # half the dominant HBM traffic).
    x_flat = x.reshape(B * N, D).astype(jnp.bfloat16)

    # ---------------- tiling -------------------------------------------------
    # Big row tiles amortize per-step overhead / fill DMA, but keep >= 2 grid
    # steps when B allows so both v7x TensorCores get work ("parallel" axis).
    cap = max(1, target_rows // N)
    if B >= 2:
        cap = min(cap, B // 2)
    block_b = 1
    for bb in range(min(cap, B), 0, -1):
        if B % bb == 0:            # attention is block-diagonal per batch element
            block_b = bb
            break
    # TODO(synk): for awkward/prime B, pad B instead of falling back to tiny divisors.
    grid_b = B // block_b
    rows = block_b * N

    # ---------------- VMEM budget (v7x has only 64 MiB physical) ------------
    stream_bytes = 2 * (rows * D * 2 + rows * out_dim_p * 4)            # x + o, double-buffered
    weight_bytes = 2 * (2 * D * inner * 2 + heads * D * out_dim_p * 2 + out_dim_p * 4)
    interm_bytes = rows * (4 * inner * 4 + 4 * out_dim_p * 4) + heads * block_b * N * N * 4
    vmem_limit = int(min(max(2 * (stream_bytes + weight_bytes + interm_bytes),
                             8 * 1024 * 1024), 60 * 1024 * 1024))

    kernel = functools.partial(_attention_kernel, block_b=block_b, seq_len=N,
                               heads=heads, dim_head=dim_head, out_dim_p=out_dim_p)

    out_flat = pl.pallas_call(
        kernel,
        out_shape=jax.ShapeDtypeStruct((B * N, out_dim_p), x.dtype),
        grid_spec=pltpu.PrefetchScalarGridSpec(
            num_scalar_prefetch=0,
            grid=(grid_b,),
            in_specs=[
                pl.BlockSpec((rows, D), lambda b: (b, 0)),
                # Weights/bias: constant index_map -> resident across the grid.
                pl.BlockSpec((D, inner), lambda b: (0, 0)),
                pl.BlockSpec((D, inner), lambda b: (0, 0)),
                pl.BlockSpec((heads, D, out_dim_p), lambda b: (0, 0, 0)),
                pl.BlockSpec((1, out_dim_p), lambda b: (0, 0)),
            ],
            out_specs=pl.BlockSpec((rows, out_dim_p), lambda b: (b, 0)),
        ),
        compiler_params=pltpu.CompilerParams(
            dimension_semantics=("parallel",),     # batch-tile axis is independent
            vmem_limit_bytes=vmem_limit,
        ),
    )(x_flat, w_q_bf, w_k_bf, w_vo_bf, b_out_p)

    return out_flat[:, :out_dim].reshape(B, N, out_dim).astype(x.dtype)


def reference_forward(x, w_qkv, w_out, b_out, *, heads, dim_head):
    """Plain-JAX reference mirroring the PyTorch forward (f32 everywhere)."""
    B, N, D = x.shape
    inner = heads * dim_head
    scale = dim_head ** (-0.5)
    qkv = x @ w_qkv                                   # (B, N, 3*inner)
    q, k, v = jnp.split(qkv, 3, axis=-1)

    def split_heads(t):
        return jnp.transpose(t.reshape(B, N, heads, dim_head), (0, 2, 1, 3))

    q, k, v = map(split_heads, (q, k, v))             # (B, H, N, Dh)
    dots = jnp.einsum('bhnd,bhmd->bhnm', q, k) * scale
    attn = jax.nn.softmax(dots, axis=-1)
    out = jnp.einsum('bhnm,bhmd->bhnd', attn, v)
    out = jnp.transpose(out, (0, 2, 1, 3)).reshape(B, N, inner)
    return out @ w_out + b_out


if __name__ == "__main__":
    # Small shapes consistent with the module.
    B, N, D = 2, 16, 32          # batch, tokens, dim
    heads, dim_head = 4, 8       # inner_dim = 32
    factor = 2                   # to_out: Linear(inner_dim, dim*factor)
    inner = heads * dim_head

    key = jax.random.PRNGKey(0)
    k1, k2, k3, k4 = jax.random.split(key, 4)
    x = jax.random.normal(k1, (B, N, D), dtype=jnp.float32)
    w_qkv = jax.random.normal(k2, (D, 3 * inner), dtype=jnp.float32) * 0.05
    w_out = jax.random.normal(k3, (inner, D * factor), dtype=jnp.float32) * 0.05
    b_out = jax.random.normal(k4, (1, D * factor), dtype=jnp.float32) * 0.01

    y = attention_forward(x, w_qkv, w_out, b_out, heads=heads, dim_head=dim_head)
    y = jax.block_until_ready(y)

    y_ref = reference_forward(x, w_qkv, w_out, b_out, heads=heads, dim_head=dim_head)
    assert y.shape == (B, N, D * factor)
    max_err = float(jnp.max(jnp.abs(y - y_ref)))
    # bf16 MXU inputs / folded bf16 W_vo with f32 accumulation -> loosened
    # tolerance vs the f32 reference.
    assert jnp.allclose(y, y_ref, atol=2e-2, rtol=2e-2), f"mismatch vs reference (max|d|={max_err})"

    print("KERNEL_OK")
</pallas_src>

<mosaic_0001>
module attributes {stable_mosaic.version = 11 : i64} {
  func.func @_attention_kernel(%arg0: i32, %arg1: memref<16x32xbf16, #tpu.memory_space<vmem>>, %arg2: memref<32x32xbf16, #tpu.memory_space<vmem>>, %arg3: memref<32x32xbf16, #tpu.memory_space<vmem>>, %arg4: memref<4x32x128xbf16, #tpu.memory_space<vmem>>, %arg5: memref<1x128xf32, #tpu.memory_space<vmem>>, %arg6: memref<16x128xf32, #tpu.memory_space<vmem>>) attributes {dimension_semantics = [#tpu.dimension_semantics<parallel>], iteration_bounds = array<i64: 2>, scalar_prefetch = 0 : i64, scratch_operands = 0 : i64, tpu.core_type = #tpu.core_type<tc>, window_params = [{transform_indices = @transform_0, window_bounds = array<i64: 16, 32>}, {pipeline_mode = #tpu.pipeline_mode<synchronous>, transform_indices = @transform_1, window_bounds = array<i64: 32, 32>}, {pipeline_mode = #tpu.pipeline_mode<synchronous>, transform_indices = @transform_2, window_bounds = array<i64: 32, 32>}, {pipeline_mode = #tpu.pipeline_mode<synchronous>, transform_indices = @transform_3, window_bounds = array<i64: 4, 32, 128>}, {pipeline_mode = #tpu.pipeline_mode<synchronous>, transform_indices = @transform_4, window_bounds = array<i64: 1, 128>}, {transform_indices = @transform_5, window_bounds = array<i64: 16, 128>}]} {
    %c0 = arith.constant 0 : index
    %c0_0 = arith.constant 0 : index
    %0 = vector.load %arg1[%c0, %c0_0] : memref<16x32xbf16, #tpu.memory_space<vmem>>, vector<16x32xbf16>
    %c0_1 = arith.constant 0 : index
    %c0_2 = arith.constant 0 : index
    %1 = vector.load %arg2[%c0_1, %c0_2] : memref<32x32xbf16, #tpu.memory_space<vmem>>, vector<32x32xbf16>
    %cst = arith.constant dense<0.000000e+00> : vector<16x32xf32>
    %2 = tpu.matmul %0, %1, %cst {dimension_numbers = #tpu.dot_dimension_numbers<[1], [0], [0], [1], [0, 0, 1, 1], [], []>} : vector<16x32xbf16>, vector<32x32xbf16>, vector<16x32xf32> -> vector<16x32xf32>
    %3 = arith.truncf %2 : vector<16x32xf32> to vector<16x32xbf16>
    %c0_3 = arith.constant 0 : index
    %c0_4 = arith.constant 0 : index
    %4 = vector.load %arg3[%c0_3, %c0_4] : memref<32x32xbf16, #tpu.memory_space<vmem>>, vector<32x32xbf16>
    %cst_5 = arith.constant dense<0.000000e+00> : vector<16x32xf32>
    %5 = tpu.matmul %0, %4, %cst_5 {dimension_numbers = #tpu.dot_dimension_numbers<[1], [0], [0], [1], [0, 0, 1, 1], [], []>} : vector<16x32xbf16>, vector<32x32xbf16>, vector<16x32xf32> -> vector<16x32xf32>
    %6 = arith.truncf %5 : vector<16x32xf32> to vector<16x32xbf16>
    %7 = vector.extract_strided_slice %3 {offsets = [0, 0], sizes = [16, 8], strides = [1, 1]} : vector<16x32xbf16> to vector<16x8xbf16>
    %8 = vector.shape_cast %7 : vector<16x8xbf16> to vector<1x16x8xbf16>
    %9 = vector.extract_strided_slice %6 {offsets = [0, 0], sizes = [16, 8], strides = [1, 1]} : vector<16x32xbf16> to vector<16x8xbf16>
    %10 = vector.shape_cast %9 : vector<16x8xbf16> to vector<1x16x8xbf16>
    %cst_6 = arith.constant dense<0.000000e+00> : vector<1x16x16xf32>
    %11 = tpu.matmul %8, %10, %cst_6 {dimension_numbers = #tpu.dot_dimension_numbers<[2], [2], [1], [1], [0, 0, 0, 1, 1, 1], [0], [0]>} : vector<1x16x8xbf16>, vector<1x16x8xbf16>, vector<1x16x16xf32> -> vector<1x16x16xf32>
    %cst_7 = arith.constant dense<0xFF800000> : vector<1x16xf32>
    %12 = vector.multi_reduction <maximumf>, %11, %cst_7 [2] : vector<1x16x16xf32> to vector<1x16xf32>
    %13 = vector.shape_cast %12 : vector<1x16xf32> to vector<1x16x1xf32>
    %14 = vector.broadcast %13 : vector<1x16x1xf32> to vector<1x16x16xf32>
    %15 = arith.subf %11, %14 : vector<1x16x16xf32>
    %16 = math.exp %15 : vector<1x16x16xf32>
    %cst_8 = arith.constant dense<0.000000e+00> : vector<1x16xf32>
    %17 = vector.multi_reduction <add>, %16, %cst_8 [2] : vector<1x16x16xf32> to vector<1x16xf32>
    %18 = vector.shape_cast %17 : vector<1x16xf32> to vector<1x16x1xf32>
    %19 = vector.broadcast %18 : vector<1x16x1xf32> to vector<1x16x16xf32>
    %20 = arith.divf %16, %19 : vector<1x16x16xf32>
    %21 = arith.truncf %20 : vector<1x16x16xf32> to vector<1x16x16xbf16>
    %c0_9 = arith.constant 0 : index
    %c0_10 = arith.constant 0 : index
    %c0_11 = arith.constant 0 : index
    %22 = vector.load %arg4[%c0_9, %c0_10, %c0_11] : memref<4x32x128xbf16, #tpu.memory_space<vmem>>, vector<1x32x128xbf16>
    %23 = vector.shape_cast %22 : vector<1x32x128xbf16> to vector<32x128xbf16>
    %cst_12 = arith.constant dense<0.000000e+00> : vector<16x128xf32>
    %24 = tpu.matmul %0, %23, %cst_12 {dimension_numbers = #tpu.dot_dimension_numbers<[1], [0], [0], [1], [0, 0, 1, 1], [], []>} : vector<16x32xbf16>, vector<32x128xbf16>, vector<16x128xf32> -> vector<16x128xf32>
    %25 = arith.truncf %24 : vector<16x128xf32> to vector<16x128xbf16>
    %26 = vector.shape_cast %25 : vector<16x128xbf16> to vector<1x16x128xbf16>
    %cst_13 = arith.constant dense<0.000000e+00> : vector<1x16x128xf32>
    %27 = tpu.matmul %21, %26, %cst_13 {dimension_numbers = #tpu.dot_dimension_numbers<[2], [1], [1], [2], [0, 0, 0, 1, 1, 2], [0], [0]>} : vector<1x16x16xbf16>, vector<1x16x128xbf16>, vector<1x16x128xf32> -> vector<1x16x128xf32>
    %28 = vector.shape_cast %27 : vector<1x16x128xf32> to vector<16x128xf32>
    %29 = vector.extract_strided_slice %3 {offsets = [0, 8], sizes = [16, 8], strides = [1, 1]} : vector<16x32xbf16> to vector<16x8xbf16>
    %30 = vector.shape_cast %29 : vector<16x8xbf16> to vector<1x16x8xbf16>
    %31 = vector.extract_strided_slice %6 {offsets = [0, 8], sizes = [16, 8], strides = [1, 1]} : vector<16x32xbf16> to vector<16x8xbf16>
    %32 = vector.shape_cast %31 : vector<16x8xbf16> to vector<1x16x8xbf16>
    %cst_14 = arith.constant dense<0.000000e+00> : vector<1x16x16xf32>
    %33 = tpu.matmul %30, %32, %cst_14 {dimension_numbers = #tpu.dot_dimension_numbers<[2], [2], [1], [1], [0, 0, 0, 1, 1, 1], [0], [0]>} : vector<1x16x8xbf16>, vector<1x16x8xbf16>, vector<1x16x16xf32> -> vector<1x16x16xf32>
    %cst_15 = arith.constant dense<0xFF800000> : vector<1x16xf32>
    %34 = vector.multi_reduction <maximumf>, %33, %cst_15 [2] : vector<1x16x16xf32> to vector<1x16xf32>
    %35 = vector.shape_cast %34 : vector<1x16xf32> to vector<1x16x1xf32>
    %36 = vector.broadcast %35 : vector<1x16x1xf32> to vector<1x16x16xf32>
    %37 = arith.subf %33, %36 : vector<1x16x16xf32>
    %38 = math.exp %37 : vector<1x16x16xf32>
    %cst_16 = arith.constant dense<0.000000e+00> : vector<1x16xf32>
    %39 = vector.multi_reduction <add>, %38, %cst_16 [2] : vector<1x16x16xf32> to vector<1x16xf32>
    %40 = vector.shape_cast %39 : vector<1x16xf32> to vector<1x16x1xf32>
    %41 = vector.broadcast %40 : vector<1x16x1xf32> to vector<1x16x16xf32>
    %42 = arith.divf %38, %41 : vector<1x16x16xf32>
    %43 = arith.truncf %42 : vector<1x16x16xf32> to vector<1x16x16xbf16>
    %c1 = arith.constant 1 : index
    %c0_17 = arith.constant 0 : index
    %c0_18 = arith.constant 0 : index
    %44 = vector.load %arg4[%c1, %c0_17, %c0_18] : memref<4x32x128xbf16, #tpu.memory_space<vmem>>, vector<1x32x128xbf16>
    %45 = vector.shape_cast %44 : vector<1x32x128xbf16> to vector<32x128xbf16>
    %cst_19 = arith.constant dense<0.000000e+00> : vector<16x128xf32>
    %46 = tpu.matmul %0, %45, %cst_19 {dimension_numbers = #tpu.dot_dimension_numbers<[1], [0], [0], [1], [0, 0, 1, 1], [], []>} : vector<16x32xbf16>, vector<32x128xbf16>, vector<16x128xf32> -> vector<16x128xf32>
    %47 = arith.truncf %46 : vector<16x128xf32> to vector<16x128xbf16>
    %48 = vector.shape_cast %47 : vector<16x128xbf16> to vector<1x16x128xbf16>
    %cst_20 = arith.constant dense<0.000000e+00> : vector<1x16x128xf32>
    %49 = tpu.matmul %43, %48, %cst_20 {dimension_numbers = #tpu.dot_dimension_numbers<[2], [1], [1], [2], [0, 0, 0, 1, 1, 2], [0], [0]>} : vector<1x16x16xbf16>, vector<1x16x128xbf16>, vector<1x16x128xf32> -> vector<1x16x128xf32>
    %50 = vector.shape_cast %49 : vector<1x16x128xf32> to vector<16x128xf32>
    %51 = arith.addf %28, %50 : vector<16x128xf32>
    %52 = vector.extract_strided_slice %3 {offsets = [0, 16], sizes = [16, 8], strides = [1, 1]} : vector<16x32xbf16> to vector<16x8xbf16>
    %53 = vector.shape_cast %52 : vector<16x8xbf16> to vector<1x16x8xbf16>
    %54 = vector.extract_strided_slice %6 {offsets = [0, 16], sizes = [16, 8], strides = [1, 1]} : vector<16x32xbf16> to vector<16x8xbf16>
    %55 = vector.shape_cast %54 : vector<16x8xbf16> to vector<1x16x8xbf16>
    %cst_21 = arith.constant dense<0.000000e+00> : vector<1x16x16xf32>
    %56 = tpu.matmul %53, %55, %cst_21 {dimension_numbers = #tpu.dot_dimension_numbers<[2], [2], [1], [1], [0, 0, 0, 1, 1, 1], [0], [0]>} : vector<1x16x8xbf16>, vector<1x16x8xbf16>, vector<1x16x16xf32> -> vector<1x16x16xf32>
    %cst_22 = arith.constant dense<0xFF800000> : vector<1x16xf32>
    %57 = vector.multi_reduction <maximumf>, %56, %cst_22 [2] : vector<1x16x16xf32> to vector<1x16xf32>
    %58 = vector.shape_cast %57 : vector<1x16xf32> to vector<1x16x1xf32>
    %59 = vector.broadcast %58 : vector<1x16x1xf32> to vector<1x16x16xf32>
    %60 = arith.subf %56, %59 : vector<1x16x16xf32>
    %61 = math.exp %60 : vector<1x16x16xf32>
    %cst_23 = arith.constant dense<0.000000e+00> : vector<1x16xf32>
    %62 = vector.multi_reduction <add>, %61, %cst_23 [2] : vector<1x16x16xf32> to vector<1x16xf32>
    %63 = vector.shape_cast %62 : vector<1x16xf32> to vector<1x16x1xf32>
    %64 = vector.broadcast %63 : vector<1x16x1xf32> to vector<1x16x16xf32>
    %65 = arith.divf %61, %64 : vector<1x16x16xf32>
    %66 = arith.truncf %65 : vector<1x16x16xf32> to vector<1x16x16xbf16>
    %c2 = arith.constant 2 : index
    %c0_24 = arith.constant 0 : index
    %c0_25 = arith.constant 0 : index
    %67 = vector.load %arg4[%c2, %c0_24, %c0_25] : memref<4x32x128xbf16, #tpu.memory_space<vmem>>, vector<1x32x128xbf16>
    %68 = vector.shape_cast %67 : vector<1x32x128xbf16> to vector<32x128xbf16>
    %cst_26 = arith.constant dense<0.000000e+00> : vector<16x128xf32>
    %69 = tpu.matmul %0, %68, %cst_26 {dimension_numbers = #tpu.dot_dimension_numbers<[1], [0], [0], [1], [0, 0, 1, 1], [], []>} : vector<16x32xbf16>, vector<32x128xbf16>, vector<16x128xf32> -> vector<16x128xf32>
    %70 = arith.truncf %69 : vector<16x128xf32> to vector<16x128xbf16>
    %71 = vector.shape_cast %70 : vector<16x128xbf16> to vector<1x16x128xbf16>
    %cst_27 = arith.constant dense<0.000000e+00> : vector<1x16x128xf32>
    %72 = tpu.matmul %66, %71, %cst_27 {dimension_numbers = #tpu.dot_dimension_numbers<[2], [1], [1], [2], [0, 0, 0, 1, 1, 2], [0], [0]>} : vector<1x16x16xbf16>, vector<1x16x128xbf16>, vector<1x16x128xf32> -> vector<1x16x128xf32>
    %73 = vector.shape_cast %72 : vector<1x16x128xf32> to vector<16x128xf32>
    %74 = arith.addf %51, %73 : vector<16x128xf32>
    %75 = vector.extract_strided_slice %3 {offsets = [0, 24], sizes = [16, 8], strides = [1, 1]} : vector<16x32xbf16> to vector<16x8xbf16>
    %76 = vector.shape_cast %75 : vector<16x8xbf16> to vector<1x16x8xbf16>
    %77 = vector.extract_strided_slice %6 {offsets = [0, 24], sizes = [16, 8], strides = [1, 1]} : vector<16x32xbf16> to vector<16x8xbf16>
    %78 = vector.shape_cast %77 : vector<16x8xbf16> to vector<1x16x8xbf16>
    %cst_28 = arith.constant dense<0.000000e+00> : vector<1x16x16xf32>
    %79 = tpu.matmul %76, %78, %cst_28 {dimension_numbers = #tpu.dot_dimension_numbers<[2], [2], [1], [1], [0, 0, 0, 1, 1, 1], [0], [0]>} : vector<1x16x8xbf16>, vector<1x16x8xbf16>, vector<1x16x16xf32> -> vector<1x16x16xf32>
    %cst_29 = arith.constant dense<0xFF800000> : vector<1x16xf32>
    %80 = vector.multi_reduction <maximumf>, %79, %cst_29 [2] : vector<1x16x16xf32> to vector<1x16xf32>
    %81 = vector.shape_cast %80 : vector<1x16xf32> to vector<1x16x1xf32>
    %82 = vector.broadcast %81 : vector<1x16x1xf32> to vector<1x16x16xf32>
    %83 = arith.subf %79, %82 : vector<1x16x16xf32>
    %84 = math.exp %83 : vector<1x16x16xf32>
    %cst_30 = arith.constant dense<0.000000e+00> : vector<1x16xf32>
    %85 = vector.multi_reduction <add>, %84, %cst_30 [2] : vector<1x16x16xf32> to vector<1x16xf32>
    %86 = vector.shape_cast %85 : vector<1x16xf32> to vector<1x16x1xf32>
    %87 = vector.broadcast %86 : vector<1x16x1xf32> to vector<1x16x16xf32>
    %88 = arith.divf %84, %87 : vector<1x16x16xf32>
    %89 = arith.truncf %88 : vector<1x16x16xf32> to vector<1x16x16xbf16>
    %c3 = arith.constant 3 : index
    %c0_31 = arith.constant 0 : index
    %c0_32 = arith.constant 0 : index
    %90 = vector.load %arg4[%c3, %c0_31, %c0_32] : memref<4x32x128xbf16, #tpu.memory_space<vmem>>, vector<1x32x128xbf16>
    %91 = vector.shape_cast %90 : vector<1x32x128xbf16> to vector<32x128xbf16>
    %cst_33 = arith.constant dense<0.000000e+00> : vector<16x128xf32>
    %92 = tpu.matmul %0, %91, %cst_33 {dimension_numbers = #tpu.dot_dimension_numbers<[1], [0], [0], [1], [0, 0, 1, 1], [], []>} : vector<16x32xbf16>, vector<32x128xbf16>, vector<16x128xf32> -> vector<16x128xf32>
    %93 = arith.truncf %92 : vector<16x128xf32> to vector<16x128xbf16>
    %94 = vector.shape_cast %93 : vector<16x128xbf16> to vector<1x16x128xbf16>
    %cst_34 = arith.constant dense<0.000000e+00> : vector<1x16x128xf32>
    %95 = tpu.matmul %89, %94, %cst_34 {dimension_numbers = #tpu.dot_dimension_numbers<[2], [1], [1], [2], [0, 0, 0, 1, 1, 2], [0], [0]>} : vector<1x16x16xbf16>, vector<1x16x128xbf16>, vector<1x16x128xf32> -> vector<1x16x128xf32>
    %96 = vector.shape_cast %95 : vector<1x16x128xf32> to vector<16x128xf32>
    %97 = arith.addf %74, %96 : vector<16x128xf32>
    %c0_35 = arith.constant 0 : index
    %c0_36 = arith.constant 0 : index
    %98 = vector.load %arg5[%c0_35, %c0_36] : memref<1x128xf32, #tpu.memory_space<vmem>>, vector<1x128xf32>
    %99 = vector.broadcast %98 : vector<1x128xf32> to vector<16x128xf32>
    %100 = arith.addf %97, %99 : vector<16x128xf32>
    %c0_37 = arith.constant 0 : index
    %c0_38 = arith.constant 0 : index
    %101 = vector.load %arg6[%c0_37, %c0_38] : memref<16x128xf32, #tpu.memory_space<vmem>>, vector<16x128xf32>
    tpu.vector_store %arg6[%c0_37, %c0_38], %100 {strides = array<i32>} : memref<16x128xf32, #tpu.memory_space<vmem>>, vector<16x128xf32>,
    return
  }
  func.func @transform_0(%arg0: i32) -> (i32, i32) {
    %c0_i32 = arith.constant 0 : i32
    %c0_i32_0 = arith.constant 0 : i32
    return %arg0, %c0_i32 : i32, i32
  }
  func.func @transform_1(%arg0: i32) -> (i32, i32) {
    %c0_i32 = arith.constant 0 : i32
    %c0_i32_0 = arith.constant 0 : i32
    %c0_i32_1 = arith.constant 0 : i32
    return %c0_i32, %c0_i32_0 : i32, i32
  }
  func.func @transform_2(%arg0: i32) -> (i32, i32) {
    %c0_i32 = arith.constant 0 : i32
    %c0_i32_0 = arith.constant 0 : i32
    %c0_i32_1 = arith.constant 0 : i32
    return %c0_i32, %c0_i32_0 : i32, i32
  }
  func.func @transform_3(%arg0: i32) -> (i32, i32, i32) {
    %c0_i32 = arith.constant 0 : i32
    %c0_i32_0 = arith.constant 0 : i32
    %c0_i32_1 = arith.constant 0 : i32
    %c0_i32_2 = arith.constant 0 : i32
    return %c0_i32, %c0_i32_0, %c0_i32_1 : i32, i32, i32
  }
  func.func @transform_4(%arg0: i32) -> (i32, i32) {
    %c0_i32 = arith.constant 0 : i32
    %c0_i32_0 = arith.constant 0 : i32
    %c0_i32_1 = arith.constant 0 : i32
    return %c0_i32, %c0_i32_0 : i32, i32
  }
  func.func @transform_5(%arg0: i32) -> (i32, i32) {
    %c0_i32 = arith.constant 0 : i32
    %c0_i32_0 = arith.constant 0 : i32
    return %arg0, %c0_i32 : i32, i32
  }
}

</mosaic_0001>

<bundles_post_ra>
// kernel: tpu_custom_call.1
= control target key start
LH: loop header
LB: loop body
LE: loop exit
PB: predicated region body
PF: predicated region fallthrough
CT: control target
= control target key end

     0   :  { %10 = vsyncpa [#allocation3], 0  ;;  %s1780_s0 = inlined_call_operand.hbm [shape: bf16[32,32], index: 0, kind: input, shape index: {}]   ;;  %s1781_s1 = inlined_call_operand.hbm [shape: bf16[32,32], index: 1, kind: input, shape index: {}]   ;;  %s1782_s2 = inlined_call_operand.hbm [shape: bf16[32,32], index: 2, kind: input, shape index: {}]   ;;  %s1783_s3 = inlined_call_operand.hbm [shape: bf16[4,32,128], index: 3, kind: input, shape index: {}]   ;;  %s1784_s4 = inlined_call_operand.vmem [shape: f32[1,128], index: 4, kind: input, shape index: {}]   ;;  %s1785_s5 = inlined_call_operand.hbm [shape: f32[32,128], index: 5, kind: output, shape index: {}]  }
   0x1   :  { %12 = vsyncpa [#allocation3 + $0x1], 0 }
   0x2   :  { %13 = vsyncpa [#allocation6], 0 }
   0x3   :  { %14 = vsyncpa [#allocation9], 0 }
   0x4   :  { %15 = vsyncpa [#allocation4], 0 }
   0x5   :  { %17 = vsyncpa [#allocation4 + $0x1], 0  ;;  %s1504_s18 = smov 0   ;;  %s1506_s19 = smov 0  }
   0x6   :  { %s1508_s20 = smov 0   ;;  %s1510_s21 = smov 0  }
   0x7 LB: > { %s1525_s22 = sadd.s32 4294967295, %s1462_s21   ;;  %s1050_s23 = sadd.s32 4294967294, %s1462_s21   ;;  %s1462_s21 = sphi %s1510_s21, %s1800_s21   ;;  %s1458_s20 = sphi %s1508_s20, %s1799_s20   ;;  %s1454_s19 = sphi %s1506_s19, %s1798_s19   ;;  %s1450_s18 = sphi %s1504_s18, %s1797_s18  }
   0x8   : > { %p43_p0 = scmp.ne.s32.totalorder %s1454_s19, %s1450_s18  ;;  %p44_p1 = scmp.eq.s32.totalorder %s1525_s22, 0 }
   0x9   : > { %p151_p2 = scmp.eq.s32.totalorder %s1525_s22, 1  ;;  %p157_p3 = scmp.eq.s32.totalorder %s1050_s23, 1 }
   0xa   : > { %p1534_p4 = por %p44_p1, %p43_p0  ;;  %p1051_p5 = scmp.ge.s32.totalorder %s1462_s21, 1 }
   0xb   : > { %p1539_p6 = por %p157_p3, %p43_p0  ;;  %p164_p7 = scmp.lt.s32.totalorder %s1462_s21, 3 }
   0xc   : > { %s175_s28 = sshll.u32 %s1781_s1, 4  ;;  %s1464_s30 = smov [#allocation5]   ;;  %s176_s28 = int_to_ptr.hbm [resolvable:$true] %s175_s28 }
   0xd   : > { %p1547_p8 = pnand %p1051_p5, %p164_p7  ;;  %s177_s6 = sshll.u32 %s1464_s30, 4  ;;  %s178_s6 = int_to_ptr.vmem [resolvable:$true] %s177_s6 }
   0xe   : > { %s189_s10 = sshll.u32 %s1782_s2, 4  ;;  %s1786_s11 = smov 64   ;;  %s190_s10 = int_to_ptr.hbm [resolvable:$true] %s189_s10 }
   0xf   : > { %p1167_p9 = pneg %p1547_p8  ;;  %s1466_s12 = smov 4  }
  0x10   : > { %s1467_s13 = smov [#allocation7]   ;;  %s203_s17 = sshll.u32 %s1783_s3, 4  ;;  %s204_s17 = int_to_ptr.hbm [resolvable:$true] %s203_s17 }
  0x11   : > { %p1555_p10 = pnand %p1167_p9, %p44_p1  ;;  %s191_s14 = sshll.u32 %s1467_s13, 4  ;;  %s192_s14 = int_to_ptr.vmem [resolvable:$true] %s191_s14 }
  0x12   : > { %s1468_s23 = smov [#allocation8]   ;;  %s1577_s27 = sadd.s32 1, %s1462_s21  }
  0x13   : > { %1170 = dma.hbm_to_vmem [thread:$0]  (!%p1555_p10), %s176_s28, 256, %s178_s6, [#allocation6], %s1786_s11, %s1786_s11, %s1466_s12  }
  0x14   : > { %1173 = dma.hbm_to_vmem [thread:$0]  (!%p1555_p10), %s190_s10, 256, %s192_s14, [#allocation6], %s1786_s11, %s1786_s11, %s1466_s12  }
  0x15   : > { %s205_s26 = sshll.u32 %s1468_s23, 4  ;;  %s27_s28 = ssub.s32 %s1462_s21, %s1577_s27  ;;  %s206_s26 = int_to_ptr.vmem [resolvable:$true] %s205_s26 }
  0x16   : > { %1176 = dma.hbm_to_vmem [thread:$0]  (!%p1555_p10), %s204_s17, 1024, %s206_s26, [#allocation9], %s1786_s11, %s1786_s11, %s1466_s12  }
  0x17   : > { %s30_s30 = sadd.s32 1, %s1458_s20  ;;  %p28_p12 = scmp.eq.s32.totalorder %s27_s28, 0 }
  0x18   : > { %p37_p13 = scmp.ne.s32.totalorder %s1458_s20, %s1454_s19  ;;  %p38_p0 = scmp.eq.s32.totalorder %s1462_s21, 0 }
  0x19   : > { %s1591_s6 = scalar_select %p28_p12, %s1458_s20, %s30_s30  }
  0x1a   : > { %p1595_p3 = por %p151_p2, %p37_p13  ;;  %p1188_p5 = scmp.lt.s32.totalorder %s1462_s21, 2 }
  0x1b   : > { %s222_s9 = sand.u32 1, %s1458_s20   ;;  %s1136_s7 = sshll.u32 %s1462_s21, 3 }
  0x1c   : > { %p39_p7 = por %p38_p0, %p37_p13  ;;  %s1056_s10 = sshll.u32 %s222_s9, 3 }
  0x1d   : > { %s231_s15 = scalar_lea.hbm %s1780_s0, %s1136_s7  ;;  %s226_s17 = scalar_lea.vmem [#allocation2], %s1056_s10 }
  0x1e   : > { %s232_s16 = sshll.u32 %s231_s15, 4  ;;  %s234_s23 = sshll.u32 %s226_s17, 4  ;;  %s233_s16 = int_to_ptr.hbm [resolvable:$true] %s232_s16  ;;  %s235_s23 = int_to_ptr.vmem [resolvable:$true] %s234_s23 }
  0x1f   : > { %p1605_p9 = pnand %p1188_p5, %p39_p7  ;;  %s223_s28 = scalar_lea.sflag [#allocation3], %s222_s9 }
  0x20   : > { %s1358_s30 = sshra.s32 %s233_s16, 4  ;;  %s1365_s10 = scalar_lea.hbm %s1780_s0, 16  ;;  %s1359_s30 = int_to_ptr.hbm [resolvable:$true] %s1358_s30 }
  0x21   : > { %s1360_s11 = scalar_lea.hbm %s1359_s30, 8  ;;  %p1362_p10 = pneg %p1605_p9 }
  0x22   : > { %p1361_p2 = scmp.ne.s32.totalorder %s1359_s30, %s1360_s11  ;;  %p1366_p0 = scmp.lt.s32.totalorder %s1359_s30, %s1780_s0 }
  0x23   : > { %p1367_p5 = scmp.lt.s32.totalorder %s1365_s10, %s1360_s11 }
  0x24   : > { %p1363_p12 = pnand %p1362_p10, %p1361_p2 }
  0x25   : > { %p1368_p7 = por %p1367_p5, %p1366_p0 }
  0x26   : > { %p1364_p13 = pneg %p1363_p12 }
  0x28   : > { %p1369_p11 = pnand %p1368_p7, %p1364_p13 }
  0x2a   : > { %1372 = shalt.err (!%p1369_p11)
}
  0x2b   : > { %s1793_s9 = smov 64   ;;  %246 = sbr.rel (%p1547_p8) target bundleno = 1187 (0x4a3), region = 40 }
  0x2c   : > { %1180 = dma.hbm_to_vmem [thread:$0]  (!%p1605_p9), %s233_s16, 128, %s235_s23, %s223_s28, %s1793_s9, %s1793_s9, %s1466_s12  }
  0x2d   : > { %s1625_s17 = sand.u32 (!%p1547_p8), 1, %s1454_s19  }
  0x2e   : > { %s1060_s30 = sshll.u32 (!%p1547_p8), %s1625_s17, 3  ;;  %s249_s11 = scalar_lea.sflag (!%p1547_p8), [#allocation3], %s1625_s17 }
  0x2f   : > { %s252_s7 = scalar_lea.vmem (!%p1547_p8), [#allocation2], %s1060_s30 }
  0x30   : > { %1433 = dma.done.wait (%p1534_p4), %s249_s11, 128  }
  0x31   : > { %1435 = vsyncadd (%p1534_p4), %s249_s11, 4294967168 }
  0x32   : > { %1437 = dma.done.wait (%p44_p1), [#allocation6], 512  }
  0x33   : > { %1439 = vsyncadd (%p44_p1), [#allocation6], 4294966784 }
  0x34   : > { %1441 = dma.done.wait (%p44_p1), [#allocation9], 1024  }
  0x35   : > { %1443 = vsyncadd (%p44_p1), [#allocation9], 4294966272  ;;  %v1139_v0 = vld [vmem:[#allocation5 + $0x8] sm:$0xff]  ;;  %v1141_v1 = vld [vmem:[#allocation7 + $0x8] sm:$0xff]  ;;  %vm321_vm0 = vcmask 261120   ;;  %vm383_vm1 = vcmask 64512  }
  0x36   : > { %331 = vmatpush.bf16.msra.mxu0 %v1139_v0  ;;  %363 = vmatpush.bf16.msra.mxu1 %v1141_v1  ;;  %v1138_v2 = vld [vmem:[#allocation5] sm:$0xff]  ;;  %v1140_v3 = vld [vmem:[#allocation7] sm:$0xff]  ;;  %s1469_s24 = smov 120   ;;  %s1470_s29 = smov 112   ;;  %vm404_vm2 = vcmask 130048   ;;  %v1143_v27 = vld [vmem:[#allocation8 + $0x8] sm:$0xff] }
  0x37   : > { %v1641_v4 = vld [vmem:[%s252_s7] sm:$0xff]  ;;  %s1471_s12 = smov 104   ;;  %477 = vmatpush.bf16.msra.mxu3 %v1143_v27  ;;  %v1142_v28 = vld [vmem:[#allocation8] sm:$0xff]  ;;  %s1064_s16 = sshll.u32 %s1625_s17, 4 }
  0x38   : > { %s1150_s28 = sshll.u32 %s1525_s22, 4  ;;  %s294_s15 = scalar_lea.vmem [#allocation10], %s1064_s16 }
  0x39   : > { %s944_s14 = scalar_lea.hbm %s1785_s5, %s1150_s28  ;;  %s945_s9 = sshll.u32 %s294_s15, 4  ;;  %s946_s9 = int_to_ptr.vmem [resolvable:$true] %s945_s9 }
  0x3a   : > { %332 = vmatpush.bf16.msra.mxu0 %v1138_v2  ;;  %364 = vmatpush.bf16.msra.mxu1 %v1140_v3  ;;  %s947_s30 = sshll.u32 %s944_s14, 4  ;;  %s933_s22 = scalar_lea.sflag [#allocation4], %s1625_s17  ;;  %s948_s30 = int_to_ptr.hbm [resolvable:$true] %s947_s30 }
  0x3b   : > { %478 = vmatpush.bf16.msra.mxu3 %v1142_v28  ;;  %s1402_s11 = sshra.s32 %s948_s30, 4  ;;  %s1403_s11 = int_to_ptr.hbm [resolvable:$true] %s1402_s11 }
  0x3c   : > { %s1404_s7 = scalar_lea.hbm %s1403_s11, 16  ;;  %p1409_p11 = scmp.lt.s32.totalorder %s1403_s11, %s1785_s5 }
  0x3d   : > { %1077 = vmatmul.msk.bf16.vlgmr.msra.gmra.mxu0 %vm321_vm0, %v1641_v4  ;;  %1086 = vmatmul.msk.bf16.vlgmr.msra.gmra.mxu1 %vm321_vm0, %v1641_v4  ;;  %p1405_p1 = scmp.ne.s32.totalorder %s1403_s11, %s1404_s7 }
  0x3e   : > { %1096 = vmatmul.msk.bf16.vlgmr.msra.gmra.mxu3 %vm321_vm0, %v1641_v4 }
  0x3f   : > { %p1406_p4 = pnand %p1405_p1, %p1595_p3 }
  0x41   : > { %p1407_p8 = pneg %p1406_p4 }
  0xba   : > { %v334_v5 = vpop.f32.mrf.mxu0  ;;  %v366_v6 = vpop.f32.mrf.mxu1 }
  0xbb   : > { %v371_v7 = vpack.c.bf16 %v366_v6, %v366_v6  ;;  %v339_v13 = vpack.c.bf16 %v334_v5, %v334_v5 }
  0xbd   : > { %v380_v11 = vunpack.c.l.b16 %v371_v7  ;;  %v375_v17 = vunpack.c.l.b16 %v339_v13 }
  0xc1   : > { %v480_v46 = vpop.f32.mrf.mxu3 }
  0xc2   : > { %v368_v8 = vpop.f32.mrf.mxu1  ;;  %v336_v10 = vpop.f32.mrf.mxu0  ;;  %v485_v47 = vpack.c.bf16 %v480_v46, %v480_v46 }
  0xc3   : > { %v372_v9 = vpack.c.bf16 %v368_v8, %v368_v8  ;;  %v340_v14 = vpack.c.bf16 %v336_v10, %v336_v10 }
  0xc4   : > { %v629_v49 = vunpack.c.l.b16 %v485_v47 }
  0xc5   : > { %v381_v12 = vunpack.c.l.b16 %v372_v9  ;;  %v376_v18 = vunpack.c.l.b16 %v340_v14 }
  0xc7   : > { %v382_v15 = vpack.c.b16 %v381_v12, %v380_v11  ;;  %v377_v19 = vpack.c.b16 %v376_v18, %v375_v17 }
  0xc9   : > { %489 = vrot.lane.b32.xlu2 %v382_v15, %s1469_s24  ;;  %v388_v16 = vsel %vm383_vm1, %v382_v15, 0  ;;  %v482_v48 = vpop.f32.mrf.mxu3 }
  0xca   : > { %397 = vmatpush.bf16.xpose.msra.mxu2 %v388_v16  ;;  %v486_v50 = vpack.c.bf16 %v482_v48, %v482_v48 }
  0xcc   : > { %v630_v51 = vunpack.c.l.b16 %v486_v50 }
  0xce   : > { %v631_v52 = vpack.c.b16 %v630_v51, %v629_v49 }
  0xd0   : > { %643 = vmatpush.bf16.msrb.mxu3 %v631_v52 }
  0xd1   : > { %487 = vrot.lane.b32.xlu2 %v377_v19, %s1469_s24  ;;  %1087 = vmatmul.msk.bf16.vlgmr.msra.gmra.mxu2 %vm383_vm1, %v377_v19 }
  0xd9   : > { %650 = vrot.lane.b32.xlu2 %v377_v19, %s1470_s29 }
  0xe1   : > { %787 = vrot.lane.b32.xlu2 %v377_v19, %s1471_s12 }
 0x123   : > { %v490_v20 = vpop.permute.xlu2 %489 }
 0x124   : > { %v495_v21 = vsel %vm383_vm1, %v490_v20, 0 }
 0x125   : > { %504 = vmatpush.bf16.xpose.msrb.mxu0 %v495_v21 }
 0x12b   : > { %v488_v22 = vpop.permute.xlu2 %487 }
 0x12c   : > { %1097 = vmatmul.msk.bf16.vlgmr.msrb.gmra.mxu0 %vm383_vm1, %v488_v22 }
 0x133   : > { %v651_v45 = vpop.permute.xlu2 %650 }
 0x13b   : > { %v788_v60 = vpop.permute.xlu2 %787 }
 0x154   : > { %v399_v23 = vpop.f32.mrf.mxu2 }
 0x155   : > { %v405_v24 = vsel %vm404_vm2, %v399_v23, -inf }
 0x156   : > { %406 = vmax.xlane.f32.xlu0 %v405_v24 }
 0x15c   : > { %v401_v25 = vpop.f32.mrf.mxu2 }
 0x15d   : > { %v408_v26 = vsel %vm404_vm2, %v401_v25, -inf }
 0x15e   : > { %409 = vmax.xlane.f32.xlu0 %v408_v26 }
 0x172   : > { %652 = vrot.lane.b32.xlu0 %v382_v15, %s1470_s29 }
 0x1a9   : > { %v1656_v29 = vpop.f32.mrf.mxu0 }
 0x1aa   : > { %v511_v30 = vsel %vm404_vm2, %v1656_v29, -inf }
 0x1ab   : > { %512 = vmax.xlane.f32.xlu2 %v511_v30 }
 0x1b1   : > { %v1660_v31 = vpop.f32.mrf.mxu0 }
 0x1b2   : > { %v514_v32 = vsel %vm404_vm2, %v1660_v31, -inf }
 0x1b3   : > { %515 = vmax.xlane.f32.xlu0 %v514_v32  ;;  %v1145_v32 = vld [vmem:[#allocation8 + $0x18] sm:$0xff] }
 0x1b4   : > { %584 = vmatpush.bf16.msrb.mxu1 %v1145_v32 }
 0x1c9   : > { %v407_v33 = vpop.xlane.xlu0 %406 }
 0x1ca   : > { %v411_v34 = vsub.f32 %v399_v23, %v407_v33  ;;  %v1144_v33 = vld [vmem:[#allocation8 + $0x10] sm:$0xff] }
 0x1cb   : > { %585 = vmatpush.bf16.msrb.mxu1 %v1144_v33 }
 0x1cc   : > { %v413_v35 = vmul.f32 1.442695, %v411_v34 }
 0x1ce   : > { %1236 = vpow2.f32 %v413_v35  ;;  %1106 = vmatmul.msk.bf16.vlgmr.msrb.gmra.mxu1 %vm321_vm0, %v1641_v4  ;;  %v1147_v35 = vld [vmem:[#allocation8 + $0x28] sm:$0xff] }
 0x1cf   : > { %747 = vmatpush.bf16.msra.mxu1 %v1147_v35 }
 0x1d1   : > { %v410_v36 = vpop.xlane.xlu0 %409 }
 0x1d2   : > { %v412_v37 = vsub.f32 %v401_v25, %v410_v36 }
 0x1d4   : > { %v1237_v38 = vpop.eup %1236  ;;  %v415_v39 = vmul.f32 1.442695, %v412_v37 }
 0x1d5   : > { %v417_v40 = vsel %vm404_vm2, %v1237_v38, 0.0 }
 0x1d6   : > { %1238 = vpow2.f32 %v415_v39  ;;  %418 = vadd.xlane.f32.xlu1 %v417_v40  ;;  %v1146_v39 = vld [vmem:[#allocation8 + $0x20] sm:$0xff] }
 0x1d7   : > { %748 = vmatpush.bf16.msra.mxu1 %v1146_v39 }
 0x1dc   : > { %v1239_v41 = vpop.eup %1238 }
 0x1dd   : > { %v420_v42 = vsel %vm404_vm2, %v1239_v41, 0.0 }
 0x1de   : > { %421 = vadd.xlane.f32.xlu1 %v420_v42  ;;  %1118 = vmatmul.msk.bf16.vlgmr.msra.gmra.mxu1 %vm321_vm0, %v1641_v4 }
 0x1e4   : > { %v653_v43 = vpop.permute.xlu0 %652 }
 0x1e5   : > { %v658_v44 = vsel %vm383_vm1, %v653_v43, 0 }
 0x1e6   : > { %667 = vmatpush.bf16.xpose.msra.mxu0 %v658_v44 }
 0x1ed   : > { %1109 = vmatmul.msk.bf16.vlgmr.msra.gmra.mxu0 %vm383_vm1, %v651_v45 }
 0x1f7   : > { %789 = vrot.lane.b32.xlu1 %v382_v15, %s1471_s12  ;;  %s1408_s12 = scalar_lea.hbm %s1785_s5, 32 }
 0x1f8   : > { %p1410_p9 = scmp.lt.s32.totalorder %s1408_s12, %s1404_s7 }
 0x1fa   : > { %p1411_p2 = por %p1410_p9, %p1409_p11 }
 0x1fc   : > { %p1412_p10 = pnand %p1411_p2, %p1407_p8 }
 0x21e   : > { %v513_v9 = vpop.xlane.xlu2 %512 }
 0x21f   : > { %v517_v14 = vsub.f32 %v1656_v29, %v513_v9 }
 0x221   : > { %v519_v19 = vmul.f32 1.442695, %v517_v14 }
 0x249   : > { %v419_v53 = vpop.xlane.xlu1 %418 }
 0x24a   : > { %1240 = vrcp.f32 %v419_v53  ;;  %v434_v59 = vand.u32 2147483648, %v419_v53  ;;  %vm428_vm4 = vweird.f32 %v419_v53  ;;  %v432_v62 = vand.u32 2147483647, %v419_v53 }
 0x24c   : > { %v435_v2 = vor.u32 1.1754944e-38, %v434_v59  ;;  %vm433_vm6 = vcmp.eq.f32.partialorder %v432_v62, 8.507059e+37 }
 0x250   : > { %v1241_v54 = vpop.eup %1240 }
 0x251   : > { %v424_v55 = vmul.f32 %v1241_v54, %v419_v53  ;;  %v422_v56 = vpop.xlane.xlu1 %421  ;;  %vm429_vm3 = vweird.f32 %v1241_v54 }
 0x252   : > { %1242 = vrcp.f32 %v422_v56  ;;  %vm430_vm5 = vmor %vm428_vm4, %vm429_vm3  ;;  %v449_v6 = vand.u32 2147483648, %v422_v56  ;;  %v447_v8 = vand.u32 2147483647, %v422_v56  ;;  %vm443_vm8 = vweird.f32 %v422_v56 }
 0x253   : > { %v425_v57 = vsub.f32 1.0, %v424_v55  ;;  %1244 = vpow2.f32 %v519_v19 }
 0x254   : > { %v450_v12 = vor.u32 1.1754944e-38, %v449_v6  ;;  %vm448_vm10 = vcmp.eq.f32.partialorder %v447_v8, 8.507059e+37 }
 0x255   : > { %v426_v58 = vmul.f32 %v1241_v54, %v425_v57  ;;  %v1148_v57 = vld [vmem:[#allocation8 + $0x30] sm:$0xff] }
 0x257   : > { %v427_v61 = vadd.f32 %v1241_v54, %v426_v58  ;;  %v587_v58 = vpop.f32.mrf.mxu1 }
 0x258   : > { %v1243_v63 = vpop.eup %1242 }
 0x259   : > { %v431_v0 = vsel %vm430_vm5, %v1241_v54, %v427_v61  ;;  %v439_v1 = vmul.f32 %v1243_v63, %v422_v56  ;;  %vm444_vm7 = vweird.f32 %v1243_v63  ;;  %v1673_v27 = vpop.eup %1244  ;;  %v1149_v56 = vld [vmem:[#allocation8 + $0x38] sm:$0xff] }
 0x25a   : > { %v436_v5 = vsel %vm433_vm6, %v435_v2, %v431_v0  ;;  %vm445_vm9 = vmor %vm443_vm8, %vm444_vm7  ;;  %v523_v29 = vsel %vm404_vm2, %v1673_v27, 0.0  ;;  %884 = vmatpush.bf16.msrb.mxu0 %v1149_v56 }
 0x25b   : > { %v440_v3 = vsub.f32 1.0, %v439_v1  ;;  %v437_v11 = vmul.f32 %v1237_v38, %v436_v5 }
 0x25d   : > { %v441_v7 = vmul.f32 %v1243_v63, %v440_v3  ;;  %v453_v17 = vpack.c.bf16 %v437_v11, %v437_v11 }
 0x25e   : > { %885 = vmatpush.bf16.msrb.mxu0 %v1148_v57 }
 0x25f   : > { %v442_v10 = vadd.f32 %v1243_v63, %v441_v7  ;;  %v624_v20 = vunpack.c.l.b16 %v453_v17  ;;  %v589_v61 = vpop.f32.mrf.mxu1 }
 0x260   : > { %v593_v62 = vpack.c.bf16 %v589_v61, %v589_v61 }
 0x261   : > { %v446_v13 = vsel %vm445_vm9, %v1243_v63, %v442_v10  ;;  %1129 = vmatmul.msk.bf16.vlgmr.msrb.gmra.mxu0 %vm321_vm0, %v1641_v4 }
 0x262   : > { %v451_v15 = vsel %vm448_vm10, %v450_v12, %v446_v13  ;;  %v602_v1 = vunpack.c.l.b16 %v593_v62 }
 0x263   : > { %v452_v16 = vmul.f32 %v1239_v41, %v451_v15  ;;  %v516_v41 = vpop.xlane.xlu0 %515 }
 0x264   : > { %v518_v43 = vsub.f32 %v1660_v31, %v516_v41 }
 0x265   : > { %v454_v18 = vpack.c.bf16 %v452_v16, %v452_v16 }
 0x266   : > { %v521_v45 = vmul.f32 1.442695, %v518_v43 }
 0x267   : > { %v625_v21 = vunpack.c.l.b16 %v454_v18  ;;  %v750_v7 = vpop.f32.mrf.mxu1 }
 0x268   : > { %v755_v4 = vpack.c.bf16 %v750_v7, %v750_v7 }
 0x269   : > { %v790_v22 = vpop.permute.xlu1 %789  ;;  %v626_v23 = vpack.c.b16 %v625_v21, %v624_v20 }
 0x26a   : > { %v795_v24 = vsel %vm383_vm1, %v790_v22, 0  ;;  %v669_v25 = vpop.f32.mrf.mxu0  ;;  %v764_v16 = vunpack.c.l.b16 %v755_v4 }
 0x26b   : > { %1108 = vmatmul.msk.bf16.vlgmr.msrb.gmra.mxu3 %vm404_vm2, %v626_v23  ;;  %v674_v26 = vsel %vm404_vm2, %v669_v25, -inf }
 0x26c   : > { %804 = vmatpush.bf16.xpose.msra.mxu3 %v795_v24  ;;  %675 = vmax.xlane.f32.xlu1 %v674_v26 }
 0x26f   : > { %v752_v15 = vpop.f32.mrf.mxu1 }
 0x270   : > { %v756_v17 = vpack.c.bf16 %v752_v15, %v752_v15 }
 0x272   : > { %v671_v28 = vpop.f32.mrf.mxu0  ;;  %v765_v24 = vunpack.c.l.b16 %v756_v17 }
 0x273   : > { %v677_v30 = vsel %vm404_vm2, %v671_v28, -inf }
 0x274   : > { %524 = vadd.xlane.f32.xlu1 %v523_v29  ;;  %678 = vmax.xlane.f32.xlu2 %v677_v30  ;;  %v766_v26 = vpack.c.b16 %v765_v24, %v764_v16 }
 0x27b   : > { %1120 = vmatmul.msk.bf16.vlgmr.msra.gmra.mxu3 %vm383_vm1, %v788_v60  ;;  %v592_v60 = vpack.c.bf16 %v587_v58, %v587_v58 }
 0x27d   : > { %v601_v63 = vunpack.c.l.b16 %v592_v60 }
 0x27f   : > { %v603_v2 = vpack.c.b16 %v602_v1, %v601_v63 }
 0x281   : > { %615 = vmatpush.bf16.msrb.mxu2 %v603_v2 }
 0x285   : > { %778 = vmatpush.bf16.msra.mxu2 %v766_v26 }
 0x2de   : > { %v887_v17 = vpop.f32.mrf.mxu0 }
 0x2df   : > { %v676_v46 = vpop.xlane.xlu1 %675 }
 0x2e0   : > { %v680_v47 = vsub.f32 %v669_v25, %v676_v46 }
 0x2e2   : > { %v682_v50 = vmul.f32 1.442695, %v680_v47 }
 0x2e7   : > { %v679_v34 = vpop.xlane.xlu2 %678  ;;  %v525_v59 = vpop.xlane.xlu1 %524 }
 0x2e8   : > { %v681_v36 = vsub.f32 %v671_v28, %v679_v34  ;;  %v540_v22 = vand.u32 2147483648, %v525_v59  ;;  %vm534_vm12 = vweird.f32 %v525_v59  ;;  %v538_v25 = vand.u32 2147483647, %v525_v59 }
 0x2ea   : > { %v684_v37 = vmul.f32 1.442695, %v681_v36  ;;  %v541_v32 = vor.u32 1.1754944e-38, %v540_v22  ;;  %vm539_vm14 = vcmp.eq.f32.partialorder %v538_v25, 8.507059e+37 }
 0x2ec   : > { %1246 = vpow2.f32 %v684_v37 }
 0x2ed   : > { %1248 = vpow2.f32 %v521_v45 }
 0x2ee   : > { %v1681_v38 = vpop.f32.mrf.mxu3  ;;  %1250 = vpow2.f32 %v682_v50 }
 0x2ef   : > { %1252 = vrcp.f32 %v525_v59 }
 0x2f2   : > { %v1683_v40 = vpop.eup %1246 }
 0x2f3   : > { %v689_v42 = vsel %vm404_vm2, %v1683_v40, 0.0  ;;  %v1693_v51 = vpop.eup %1248 }
 0x2f4   : > { %690 = vadd.xlane.f32.xlu1 %v689_v42  ;;  %v526_v53 = vsel %vm404_vm2, %v1693_v51, 0.0  ;;  %v1698_v54 = vpop.eup %1250 }
 0x2f5   : > { %v686_v55 = vsel %vm404_vm2, %v1698_v54, 0.0  ;;  %v1253_v0 = vpop.eup %1252 }
 0x2f6   : > { %v1688_v44 = vpop.f32.mrf.mxu3  ;;  %v530_v3 = vmul.f32 %v1253_v0, %v525_v59  ;;  %vm535_vm11 = vweird.f32 %v1253_v0 }
 0x2f7   : > { %vm536_vm13 = vmor %vm534_vm12, %vm535_vm11 }
 0x2f8   : > { %v531_v8 = vsub.f32 1.0, %v530_v3 }
 0x2fa   : > { %v532_v11 = vmul.f32 %v1253_v0, %v531_v8 }
 0x2fc   : > { %v533_v19 = vadd.f32 %v1253_v0, %v532_v11 }
 0x2fe   : > { %v806_v48 = vpop.f32.mrf.mxu3  ;;  %v537_v29 = vsel %vm536_vm13, %v1253_v0, %v533_v19  ;;  %v892_v19 = vpack.c.bf16 %v887_v17, %v887_v17 }
 0x2ff   : > { %v811_v49 = vsel %vm404_vm2, %v806_v48, -inf  ;;  %v542_v35 = vsel %vm539_vm14, %v541_v32, %v537_v29 }
 0x300   : > { %812 = vmax.xlane.f32.xlu0 %v811_v49  ;;  %v543_v46 = vmul.f32 %v1673_v27, %v542_v35 }
 0x306   : > { %v808_v52 = vpop.f32.mrf.mxu3 }
 0x307   : > { %v814_v31 = vsel %vm404_vm2, %v808_v52, -inf }
 0x308   : > { %815 = vmax.xlane.f32.xlu2 %v814_v31  ;;  %527 = vadd.xlane.f32.xlu0 %v526_v53 }
 0x310   : > { %687 = vadd.xlane.f32.xlu2 %v686_v55  ;;  %v559_v55 = vpack.c.bf16 %v543_v46, %v543_v46 }
 0x312   : > { %v596_v63 = vunpack.c.l.b16 %v559_v55 }
 0x367   : > { %v1704_v9 = vpop.xlane.xlu1 %690 }
 0x368   : > { %vm712_vm6 = vweird.f32 %v1704_v9  ;;  %v718_v62 = vand.u32 2147483648, %v1704_v9 }
 0x36a   : > { %v719_v8 = vor.u32 1.1754944e-38, %v718_v62  ;;  %v1235_v62 = vld [vmem:[%s1784_s4] ss:$0 sm:$0xff] }
 0x373   : > { %v813_v5 = vpop.xlane.xlu0 %812 }
 0x374   : > { %v817_v6 = vsub.f32 %v806_v48, %v813_v5 }
 0x376   : > { %v819_v10 = vmul.f32 1.442695, %v817_v6 }
 0x378   : > { %1254 = vpow2.f32 %v819_v10 }
 0x379   : > { %1256 = vrcp.f32 %v1704_v9 }
 0x37b   : > { %v816_v12 = vpop.xlane.xlu2 %815  ;;  %v528_v13 = vpop.xlane.xlu0 %527 }
 0x37c   : > { %v818_v14 = vsub.f32 %v808_v52, %v816_v12  ;;  %1258 = vrcp.f32 %v528_v13  ;;  %v555_v41 = vand.u32 2147483648, %v528_v13  ;;  %v553_v43 = vand.u32 2147483647, %v528_v13 }
 0x37d   : > { %vm549_vm0 = vweird.f32 %v528_v13 }
 0x37e   : > { %v1707_v18 = vpop.eup %1254  ;;  %v821_v20 = vmul.f32 1.442695, %v818_v14  ;;  %v556_v50 = vor.u32 1.1754944e-38, %v555_v41  ;;  %vm554_vm3 = vcmp.eq.f32.partialorder %v553_v43, 8.507059e+37 }
 0x37f   : > { %v1709_v21 = vpop.eup %1256  ;;  %v823_v23 = vsel %vm404_vm2, %v1707_v18, 0.0 }
 0x380   : > { %1260 = vpow2.f32 %v821_v20  ;;  %824 = vadd.xlane.f32.xlu0 %v823_v23  ;;  %v708_v30 = vmul.f32 %v1709_v21, %v1704_v9  ;;  %vm713_vm4 = vweird.f32 %v1709_v21  ;;  %v889_v20 = vpop.f32.mrf.mxu0 }
 0x381   : > { %vm1726_vm7 = vmor %vm712_vm6, %vm713_vm4  ;;  %v893_v22 = vpack.c.bf16 %v889_v20, %v889_v20 }
 0x382   : > { %v1259_v28 = vpop.eup %1258  ;;  %v709_v39 = vsub.f32 1.0, %v708_v30 }
 0x383   : > { %v545_v33 = vmul.f32 %v1259_v28, %v528_v13  ;;  %v688_v34 = vpop.xlane.xlu2 %687  ;;  %vm550_vm15 = vweird.f32 %v1259_v28  ;;  %v902_v23 = vunpack.c.l.b16 %v893_v22 }
 0x384   : > { %1262 = vrcp.f32 %v688_v34  ;;  %v710_v49 = vmul.f32 %v1709_v21, %v709_v39  ;;  %vm551_vm1 = vmor %vm549_vm0, %vm550_vm15  ;;  %v703_v27 = vand.u32 2147483648, %v688_v34  ;;  %v701_v60 = vand.u32 2147483647, %v688_v34 }
 0x385   : > { %v546_v36 = vsub.f32 1.0, %v545_v33  ;;  %vm697_vm8 = vweird.f32 %v688_v34 }
 0x386   : > { %v1715_v37 = vpop.eup %1260  ;;  %v711_v58 = vadd.f32 %v1709_v21, %v710_v49  ;;  %v704_v3 = vor.u32 1.1754944e-38, %v703_v27  ;;  %vm702_vm10 = vcmp.eq.f32.partialorder %v701_v60, 8.507059e+37 }
 0x387   : > { %v547_v42 = vmul.f32 %v1259_v28, %v546_v36  ;;  %v826_v45 = vsel %vm404_vm2, %v1715_v37, 0.0 }
 0x388   : > { %827 = vadd.xlane.f32.xlu2 %v826_v45  ;;  %v715_v5 = vsel %vm1726_vm7, %v1709_v21, %v711_v58  ;;  %v901_v21 = vunpack.c.l.b16 %v892_v19 }
 0x389   : > { %v548_v47 = vadd.f32 %v1259_v28, %v547_v42 }
 0x38a   : > { %v1263_v48 = vpop.eup %1262  ;;  %v903_v24 = vpack.c.b16 %v902_v23, %v901_v21 }
 0x38b   : > { %v552_v52 = vsel %vm551_vm1, %v1259_v28, %v548_v47  ;;  %v693_v31 = vmul.f32 %v1263_v48, %v688_v34  ;;  %vm698_vm5 = vweird.f32 %v1263_v48 }
 0x38c   : > { %v557_v53 = vsel %vm554_vm3, %v556_v50, %v552_v52  ;;  %vm699_vm9 = vmor %vm697_vm8, %vm698_vm5  ;;  %915 = vmatpush.bf16.msrb.mxu1 %v903_v24 }
 0x38d   : > { %v694_v56 = vsub.f32 1.0, %v693_v31  ;;  %v558_v57 = vmul.f32 %v1693_v51, %v557_v53  ;;  %v716_v51 = vand.u32 2147483647, %v1704_v9 }
 0x38f   : > { %v695_v59 = vmul.f32 %v1263_v48, %v694_v56  ;;  %v560_v61 = vpack.c.bf16 %v558_v57, %v558_v57  ;;  %vm717_vm11 = vcmp.eq.f32.partialorder %v716_v51, 8.507059e+37 }
 0x390   : > { %v720_v4 = vsel %vm717_vm11, %v719_v8, %v715_v5 }
 0x391   : > { %v696_v1 = vadd.f32 %v1263_v48, %v695_v59  ;;  %v597_v2 = vunpack.c.l.b16 %v560_v61  ;;  %v721_v11 = vmul.f32 %v1683_v40, %v720_v4 }
 0x393   : > { %v700_v6 = vsel %vm699_vm9, %v1263_v48, %v696_v1  ;;  %v598_v7 = vpack.c.b16 %v597_v2, %v596_v63  ;;  %v723_v13 = vpack.c.bf16 %v721_v11, %v721_v11 }
 0x394   : > { %v705_v10 = vsel %vm702_vm10, %v704_v3, %v700_v6 }
 0x395   : > { %1107 = vmatmul.msk.bf16.vlgmr.msrb.gmra.mxu2 %vm404_vm2, %v598_v7  ;;  %v706_v9 = vmul.f32 %v1698_v54, %v705_v10  ;;  %v760_v15 = vunpack.c.l.b16 %v723_v13 }
 0x397   : > { %v722_v12 = vpack.c.bf16 %v706_v9, %v706_v9 }
 0x399   : > { %v759_v14 = vunpack.c.l.b16 %v722_v12 }
 0x39b   : > { %v761_v16 = vpack.c.b16 %v760_v15, %v759_v14 }
 0x3a5   : > { %1119 = vmatmul.msk.bf16.vlgmr.msra.gmra.mxu2 %vm404_vm2, %v761_v16 }
 0x3f3   : > { %v825_v25 = vpop.xlane.xlu0 %824 }
 0x3f4   : > { %1264 = vrcp.f32 %v825_v25  ;;  %v840_v30 = vand.u32 2147483648, %v825_v25  ;;  %vm834_vm13 = vweird.f32 %v825_v25  ;;  %v838_v33 = vand.u32 2147483647, %v825_v25 }
 0x3f6   : > { %v841_v39 = vor.u32 1.1754944e-38, %v840_v30  ;;  %vm839_vm15 = vcmp.eq.f32.partialorder %v838_v33, 8.507059e+37 }
 0x3fa   : > { %v1265_v54 = vpop.eup %1264 }
 0x3fb   : > { %v830_v26 = vmul.f32 %v1265_v54, %v825_v25  ;;  %v828_v40 = vpop.xlane.xlu2 %827  ;;  %vm835_vm12 = vweird.f32 %v1265_v54 }
 0x3fc   : > { %1266 = vrcp.f32 %v828_v40  ;;  %vm836_vm14 = vmor %vm834_vm13, %vm835_vm12  ;;  %v855_v43 = vand.u32 2147483648, %v828_v40  ;;  %v853_v46 = vand.u32 2147483647, %v828_v40  ;;  %vm849_vm1 = vweird.f32 %v828_v40 }
 0x3fd   : > { %v831_v28 = vsub.f32 1.0, %v830_v26 }
 0x3fe   : > { %v856_v49 = vor.u32 1.1754944e-38, %v855_v43  ;;  %vm854_vm4 = vcmp.eq.f32.partialorder %v853_v46, 8.507059e+37 }
 0x3ff   : > { %v832_v29 = vmul.f32 %v1265_v54, %v831_v28 }
 0x401   : > { %v833_v32 = vadd.f32 %v1265_v54, %v832_v29 }
 0x402   : > { %v1267_v34 = vpop.eup %1266 }
 0x403   : > { %v837_v35 = vsel %vm836_vm14, %v1265_v54, %v833_v32  ;;  %v845_v36 = vmul.f32 %v1267_v34, %v828_v40  ;;  %vm850_vm0 = vweird.f32 %v1267_v34 }
 0x404   : > { %v842_v42 = vsel %vm839_vm15, %v841_v39, %v837_v35  ;;  %vm851_vm3 = vmor %vm849_vm1, %vm850_vm0 }
 0x405   : > { %v846_v41 = vsub.f32 1.0, %v845_v36  ;;  %v843_v47 = vmul.f32 %v1707_v18, %v842_v42 }
 0x407   : > { %v847_v45 = vmul.f32 %v1267_v34, %v846_v41  ;;  %v859_v31 = vpack.c.bf16 %v843_v47, %v843_v47 }
 0x409   : > { %v848_v48 = vadd.f32 %v1267_v34, %v847_v45  ;;  %v896_v56 = vunpack.c.l.b16 %v859_v31 }
 0x40b   : > { %v852_v50 = vsel %vm851_vm3, %v1267_v34, %v848_v48 }
 0x40c   : > { %v857_v52 = vsel %vm854_vm4, %v856_v49, %v852_v50 }
 0x40d   : > { %v858_v53 = vmul.f32 %v1715_v37, %v857_v52 }
 0x40f   : > { %v860_v55 = vpack.c.bf16 %v858_v53, %v858_v53 }
 0x411   : > { %v897_v57 = vunpack.c.l.b16 %v860_v55 }
 0x413   : > { %v898_v58 = vpack.c.b16 %v897_v57, %v896_v56 }
 0x415   : > { %1130 = vmatmul.msk.bf16.vlgmr.msrb.gmra.mxu1 %vm404_vm2, %v898_v58 }
 0x418   : > { %v617_v27 = vpop.f32.mrf.mxu2 }
 0x419   : > { %v646_v60 = vadd.f32 %v1681_v38, %v617_v27 }
 0x420   : > { %v619_v18 = vpop.f32.mrf.mxu2 }
 0x421   : > { %v648_v1 = vadd.f32 %v1688_v44, %v619_v18 }
 0x428   : > { %v780_v59 = vpop.f32.mrf.mxu2 }
 0x429   : > { %v785_v61 = vadd.f32 %v780_v59, %v646_v60 }
 0x430   : > { %v782_v51 = vpop.f32.mrf.mxu2 }
 0x431   : > { %v786_v38 = vadd.f32 %v782_v51, %v648_v1 }
 0x492   : > { %v917_v63 = vpop.f32.mrf.mxu1 }
 0x493   : > { %v922_v0 = vadd.f32 %v917_v63, %v785_v61 }
 0x495   : > { %v928_v37 = vadd.f32 %v1235_v62, %v922_v0 }
 0x497   : > { %930 = vst [vmem:[%s294_s15] sm:$0xff] %v928_v37 }
 0x49a   : > { %v919_v2 = vpop.f32.mrf.mxu1 }
 0x49b   : > { %v923_v3 = vadd.f32 %v919_v2, %v786_v38 }
 0x49d   : > { %v929_v5 = vadd.f32 %v1235_v62, %v923_v3 }
 0x49f   : > { %931 = vst [vmem:[%s294_s15 + $0x8] sm:$0xff] %v929_v5 }
 0x4a0   : > { %1415 = shalt.err (!%p1412_p10)
}
 0x4a1   : > { %s1472_s17 = smov 128   ;;  %s1473_s26 = smov 8  }
 0x4a2   : > { %1165 = dma.vmem_to_hbm [thread:$0]  (%p1595_p3), %s946_s9, 256, %s948_s30, %s933_s22, %s1472_s17, %s1472_s17, %s1473_s26  }
 0x4a3 PF: > { %s962_s28 = sand.u32 1, %s1450_s18   ;;  %p1796_p12 = scmp.ge.s32.totalorder %s1462_s21, 2 }
 0x4a4   : > { %s963_s13 = scalar_lea.sflag [#allocation4], %s962_s28 }
 0x4a5   : > { %p1182_p13 = pnand %p1796_p12, %p1539_p6 }
 0x4a7   : > { %p1183_p0 = pneg %p1182_p13 }
 0x4a9   : > { %1445 = dma.done.wait (%p1183_p0), %s963_s13, 256  }
 0x4aa   : > { %1447 = vsyncadd (%p1183_p0), %s963_s13, 4294967040  ;;  %p20_p5 = scmp.ge.s32.totalorder %s1577_s27, 4   ;;  %s1797_s18 = smov %s1454_s19 }
 0x4ab   : > { %s1798_s19 = smov %s1458_s20  ;;  %s1799_s20 = smov %s1591_s6 }
 0x4ac   : > { %s1800_s21 = smov %s1577_s27  ;;  %22 = sbr.rel (!%p20_p5) target bundleno = 7 (0x7), region = 100 }
 0x4b1   :  { %969 = vsyncpa [#allocation3], 1 }
 0x4b2   :  { %971 = vsyncpa [#allocation3 + $0x1], 1 }
 0x4b3   :  { %972 = vsyncpa [#allocation6], 1 }
 0x4b4   :  { %973 = vsyncpa [#allocation9], 1 }
 0x4b5   :  { %974 = vsyncpa [#allocation4], 1 }
 0x4b6   :  { %976 = vsyncpa [#allocation4 + $0x1], 1 }

</bundles_post_ra>
